<compile_context>
chip_gen: v7x
topology: tpu7x:2x2x1
jax: 0.10.0
libtpu: 0.0.40
codegen_flags: <defaults>
</compile_context>

<pallas_src>
import jax
import jax.numpy as jnp
from jax.experimental import pallas as pl
from jax.experimental.pallas import tpu as pltpu

DEGREE = 5           # Chebyshev degree of every layer
IN_DIM = 2
HID_DIM = 32
OUT_DIM = 1
MAX_TILE_B = 512     # lane-axis batch tile (sweepable: 256/512/1024)

assert DEGREE >= 1, "kernel assumes degree >= 1 (uses T_1 explicitly)"


def _write_cheb_features(h, f_ref):
    """Stream the stacked Chebyshev feature slab of `h` into VMEM scratch `f_ref`.

    h:     (in_dim, TB) activations, batch on lanes, f32.
    f_ref: ((DEGREE+1)*in_dim, TB) scratch; row d*in_dim + i = T_d(tanh(h[i, :])).

    T_d = 2t*T_{d-1} - T_{d-2}; each (in_dim, TB) block is written as soon as it
    is produced so only {t2, T_{d-1}, T_{d-2}} stay live (bounded vreg pressure).
    """
    in_dim = h.shape[0]
    dt = f_ref.dtype
    t = jnp.tanh(h)
    t2 = t + t                                              # hoisted 2*t (FMA form)
    f_ref[0:in_dim, :] = jnp.ones_like(t).astype(dt)        # T_0
    f_ref[in_dim:2 * in_dim, :] = t.astype(dt)              # T_1
    tm2, tm1 = jnp.ones_like(t), t
    for d in range(2, DEGREE + 1):
        tm2, tm1 = tm1, t2 * tm1 - tm2
        f_ref[d * in_dim:(d + 1) * in_dim, :] = tm1.astype(dt)


def chebykan_kernel(x_ref, w1_ref, w2_ref, w3_ref, o_ref, f1_ref, f2_ref, f3_ref):
    # layer 1: 2 -> 32   — one (32,12)@(12,TB) dot (no per-input lane-broadcast FMAs)
    _write_cheb_features(x_ref[...], f1_ref)
    h1 = jnp.dot(w1_ref[...], f1_ref[...], preferred_element_type=jnp.float32)
    # layer 2: 32 -> 32  — degrees fused into one K=192 dot
    _write_cheb_features(h1, f2_ref)
    h2 = jnp.dot(w2_ref[...], f2_ref[...], preferred_element_type=jnp.float32)
    # layer 3: 32 -> 1   — one K=192 dot, (1, TB) lane-dense output
    _write_cheb_features(h2, f3_ref)
    o_ref[...] = jnp.dot(w3_ref[...], f3_ref[...], preferred_element_type=jnp.float32)


def _fuse_weights(c, dtype):
    """(in, out, deg+1) -> (out, (deg+1)*in); column k = d*in + i holds c[i, o, d].

    This column order exactly matches the feature-slab row order written by
    _write_cheb_features (k = d*in_dim + i)."""
    in_dim, out_dim, d1 = c.shape
    return jnp.transpose(c, (1, 2, 0)).reshape(out_dim, d1 * in_dim).astype(dtype)


def _num_tensorcores():
    try:
        kind = jax.devices()[0].device_kind.lower()
    except Exception:
        return 1
    return 2 if "v7" in kind else 1   # v7x: 2 TensorCores/chip; v5e/v6e: 1


def _pick_tile_b(n, max_tile=MAX_TILE_B):
    """Lane-axis tile: one big step on 1-TC chips for small N; >= 2 steps on v7x."""
    ntc = _num_tensorcores()
    n128 = ((max(int(n), 1) + 127) // 128) * 128
    tile = min(max_tile, n128)
    if ntc > 1 and n128 >= 2 * 128:
        per_core = max(128, ((n128 // ntc) // 128) * 128)
        tile = min(tile, per_core)
    return tile


def chebykan_forward(x, c1, c2, c3, *, use_bf16_dots=False, max_tile_b=MAX_TILE_B):
    """x: (N, 2) float32; c*: per-layer (in, out, degree+1) coefficient tensors.

    Returns (N, 1) float32, matching the PyTorch module's forward.
    """
    n = x.shape[0]
    assert x.shape[1] == IN_DIM

    dot_dtype = jnp.bfloat16 if use_bf16_dots else jnp.float32
    tile_b = _pick_tile_b(n, max_tile_b)
    n_pad = int(pl.cdiv(n, tile_b)) * tile_b

    # Batch-on-lanes layout; zero-pad batch to a lane-aligned tile multiple.
    # TODO(synk): store collocation points as (2, N) upstream to skip this transpose.
    xt = jnp.transpose(x).astype(jnp.float32)                  # (2, N)
    if n_pad != n:
        xt = jnp.pad(xt, ((0, 0), (0, n_pad - n)))

    w1 = _fuse_weights(c1, dot_dtype)                          # (32, 12)
    w2 = _fuse_weights(c2, dot_dtype)                          # (32, 192)
    w3 = _fuse_weights(c3, dot_dtype)                          # (1, 192)

    k1 = (DEGREE + 1) * IN_DIM                                 # 12
    k2 = (DEGREE + 1) * HID_DIM                                # 192

    out_t = pl.pallas_call(
        chebykan_kernel,
        out_shape=jax.ShapeDtypeStruct((OUT_DIM, n_pad), jnp.float32),
        grid_spec=pltpu.PrefetchScalarGridSpec(
            num_scalar_prefetch=0,
            grid=(n_pad // tile_b,),
            in_specs=[
                pl.BlockSpec((IN_DIM, tile_b), lambda i: (0, i)),
                pl.BlockSpec(w1.shape, lambda i: (0, 0)),      # resident weights
                pl.BlockSpec(w2.shape, lambda i: (0, 0)),
                pl.BlockSpec(w3.shape, lambda i: (0, 0)),
            ],
            out_specs=pl.BlockSpec((OUT_DIM, tile_b), lambda i: (0, i)),
            scratch_shapes=[
                pltpu.VMEM((k1, tile_b), dot_dtype),           # layer-1 feature slab
                pltpu.VMEM((k2, tile_b), dot_dtype),           # layer-2 feature slab
                pltpu.VMEM((k2, tile_b), dot_dtype),           # layer-3 feature slab
            ],
        ),
        compiler_params=pltpu.CompilerParams(
            dimension_semantics=("parallel",)),
    )(xt, w1, w2, w3)

    # Lane-dense (1, N_pad) output -> (N, 1) for the caller.
    return jnp.transpose(out_t[:, :n])


def init_params(key):
    """Deterministic init matching nn.init.normal_(std=1/(in_dim*(degree+1)))."""
    k1, k2, k3 = jax.random.split(key, 3)
    d1 = DEGREE + 1
    c1 = jax.random.normal(k1, (IN_DIM, HID_DIM, d1), jnp.float32) / (IN_DIM * d1)
    c2 = jax.random.normal(k2, (HID_DIM, HID_DIM, d1), jnp.float32) / (HID_DIM * d1)
    c3 = jax.random.normal(k3, (HID_DIM, OUT_DIM, d1), jnp.float32) / (HID_DIM * d1)
    return c1, c2, c3


def reference_forward(x, c1, c2, c3):
    """Pure-JAX reference of the PyTorch forward (einsum 'bid,iod->bo' per layer)."""
    def layer(h, c):
        deg = c.shape[-1] - 1
        t = jnp.tanh(h)
        terms = [jnp.ones_like(t), t]
        for _ in range(deg - 1):
            terms.append(2.0 * t * terms[-1] - terms[-2])
        feats = jnp.stack(terms[: deg + 1], axis=-1)           # (b, i, d)
        return jnp.einsum('bid,iod->bo', feats, c)
    return layer(layer(layer(x, c1), c2), c3)


if __name__ == "__main__":
    key = jax.random.PRNGKey(0)
    kx, kp = jax.random.split(key)
    c1, c2, c3 = init_params(kp)

    # PINN collocation-style input: (N, 2) points (e.g. (x, t) pairs).
    x = jax.random.uniform(kx, (256, IN_DIM), jnp.float32, minval=-1.0, maxval=1.0)
    out = jax.block_until_ready(chebykan_forward(x, c1, c2, c3))
    ref = reference_forward(x, c1, c2, c3)
    assert out.shape == (256, OUT_DIM)
    assert jnp.allclose(out, ref, atol=1e-5, rtol=1e-5), "mismatch vs reference"

    # Non-multiple batch exercises the padding + tile-picking path.
    x2 = jax.random.uniform(jax.random.PRNGKey(1), (1000, IN_DIM), jnp.float32,
                            minval=-1.0, maxval=1.0)
    out2 = jax.block_until_ready(chebykan_forward(x2, c1, c2, c3))
    ref2 = reference_forward(x2, c1, c2, c3)
    assert out2.shape == (1000, OUT_DIM)
    assert jnp.allclose(out2, ref2, atol=1e-5, rtol=1e-5), "mismatch vs reference (padded)"

    # bf16-dot path (v6e/v7x fast MXU route): f32 tanh/recurrence, bf16 at the dot
    # boundary only -> looser tolerance by design.
    out3 = jax.block_until_ready(chebykan_forward(x, c1, c2, c3, use_bf16_dots=True))
    assert out3.shape == (256, OUT_DIM)
    assert jnp.allclose(out3, ref, atol=5e-2, rtol=5e-2), "mismatch vs reference (bf16 dots)"

    print("KERNEL_OK")
</pallas_src>

<mosaic_0001>
module attributes {stable_mosaic.version = 11 : i64} {
  func.func @chebykan_kernel(%arg0: i32, %arg1: memref<2x256xf32, #tpu.memory_space<vmem>>, %arg2: memref<32x12xf32, #tpu.memory_space<vmem>>, %arg3: memref<32x192xf32, #tpu.memory_space<vmem>>, %arg4: memref<1x192xf32, #tpu.memory_space<vmem>>, %arg5: memref<1x256xf32, #tpu.memory_space<vmem>>, %arg6: memref<12x256xf32, #tpu.memory_space<vmem>>, %arg7: memref<192x256xf32, #tpu.memory_space<vmem>>, %arg8: memref<192x256xf32, #tpu.memory_space<vmem>>) attributes {dimension_semantics = [#tpu.dimension_semantics<parallel>], iteration_bounds = array<i64: 1>, scalar_prefetch = 0 : i64, scratch_operands = 3 : i64, tpu.core_type = #tpu.core_type<tc>, window_params = [{transform_indices = @transform_0, window_bounds = array<i64: 2, 256>}, {pipeline_mode = #tpu.pipeline_mode<synchronous>, transform_indices = @transform_1, window_bounds = array<i64: 32, 12>}, {pipeline_mode = #tpu.pipeline_mode<synchronous>, transform_indices = @transform_2, window_bounds = array<i64: 32, 192>}, {pipeline_mode = #tpu.pipeline_mode<synchronous>, transform_indices = @transform_3, window_bounds = array<i64: 1, 192>}, {transform_indices = @transform_4, window_bounds = array<i64: 1, 256>}]} {
    %c0 = arith.constant 0 : index
    %c0_0 = arith.constant 0 : index
    %0 = vector.load %arg1[%c0, %c0_0] : memref<2x256xf32, #tpu.memory_space<vmem>>, vector<2x256xf32>
    %1 = math.tanh %0 : vector<2x256xf32>
    %2 = arith.addf %1, %1 : vector<2x256xf32>
    %cst = arith.constant 1.000000e+00 : f32
    %3 = vector.broadcast %cst : f32 to vector<2x256xf32>
    %c0_1 = arith.constant 0 : index
    %c0_2 = arith.constant 0 : index
    %4 = vector.load %arg6[%c0_1, %c0_2] : memref<12x256xf32, #tpu.memory_space<vmem>>, vector<2x256xf32>
    tpu.vector_store %arg6[%c0_1, %c0_2], %3 {strides = array<i32>} : memref<12x256xf32, #tpu.memory_space<vmem>>, vector<2x256xf32>,
    %c2 = arith.constant 2 : index
    %c0_3 = arith.constant 0 : index
    %5 = vector.load %arg6[%c2, %c0_3] : memref<12x256xf32, #tpu.memory_space<vmem>>, vector<2x256xf32>
    tpu.vector_store %arg6[%c2, %c0_3], %1 {strides = array<i32>} : memref<12x256xf32, #tpu.memory_space<vmem>>, vector<2x256xf32>,
    %cst_4 = arith.constant 1.000000e+00 : f32
    %6 = vector.broadcast %cst_4 : f32 to vector<2x256xf32>
    %7 = arith.mulf %2, %1 : vector<2x256xf32>
    %8 = arith.subf %7, %6 : vector<2x256xf32>
    %c4 = arith.constant 4 : index
    %c0_5 = arith.constant 0 : index
    %9 = vector.load %arg6[%c4, %c0_5] : memref<12x256xf32, #tpu.memory_space<vmem>>, vector<2x256xf32>
    tpu.vector_store %arg6[%c4, %c0_5], %8 {strides = array<i32>} : memref<12x256xf32, #tpu.memory_space<vmem>>, vector<2x256xf32>,
    %10 = arith.mulf %2, %8 : vector<2x256xf32>
    %11 = arith.subf %10, %1 : vector<2x256xf32>
    %c6 = arith.constant 6 : index
    %c0_6 = arith.constant 0 : index
    %12 = vector.load %arg6[%c6, %c0_6] : memref<12x256xf32, #tpu.memory_space<vmem>>, vector<2x256xf32>
    tpu.vector_store %arg6[%c6, %c0_6], %11 {strides = array<i32>} : memref<12x256xf32, #tpu.memory_space<vmem>>, vector<2x256xf32>,
    %13 = arith.mulf %2, %11 : vector<2x256xf32>
    %14 = arith.subf %13, %8 : vector<2x256xf32>
    %c8 = arith.constant 8 : index
    %c0_7 = arith.constant 0 : index
    %15 = vector.load %arg6[%c8, %c0_7] : memref<12x256xf32, #tpu.memory_space<vmem>>, vector<2x256xf32>
    tpu.vector_store %arg6[%c8, %c0_7], %14 {strides = array<i32>} : memref<12x256xf32, #tpu.memory_space<vmem>>, vector<2x256xf32>,
    %16 = arith.mulf %2, %14 : vector<2x256xf32>
    %17 = arith.subf %16, %11 : vector<2x256xf32>
    %c10 = arith.constant 10 : index
    %c0_8 = arith.constant 0 : index
    %18 = vector.load %arg6[%c10, %c0_8] : memref<12x256xf32, #tpu.memory_space<vmem>>, vector<2x256xf32>
    tpu.vector_store %arg6[%c10, %c0_8], %17 {strides = array<i32>} : memref<12x256xf32, #tpu.memory_space<vmem>>, vector<2x256xf32>,
    %c0_9 = arith.constant 0 : index
    %c0_10 = arith.constant 0 : index
    %19 = vector.load %arg2[%c0_9, %c0_10] : memref<32x12xf32, #tpu.memory_space<vmem>>, vector<32x12xf32>
    %c0_11 = arith.constant 0 : index
    %c0_12 = arith.constant 0 : index
    %20 = vector.load %arg6[%c0_11, %c0_12] : memref<12x256xf32, #tpu.memory_space<vmem>>, vector<12x256xf32>
    %cst_13 = arith.constant dense<0.000000e+00> : vector<32x256xf32>
    %21 = tpu.matmul %19, %20, %cst_13 {dimension_numbers = #tpu.dot_dimension_numbers<[1], [0], [0], [1], [0, 0, 1, 1], [], []>} : vector<32x12xf32>, vector<12x256xf32>, vector<32x256xf32> -> vector<32x256xf32>
    %22 = math.tanh %21 : vector<32x256xf32>
    %23 = arith.addf %22, %22 : vector<32x256xf32>
    %cst_14 = arith.constant 1.000000e+00 : f32
    %24 = vector.broadcast %cst_14 : f32 to vector<32x256xf32>
    %c0_15 = arith.constant 0 : index
    %c0_16 = arith.constant 0 : index
    %25 = vector.load %arg7[%c0_15, %c0_16] : memref<192x256xf32, #tpu.memory_space<vmem>>, vector<32x256xf32>
    tpu.vector_store %arg7[%c0_15, %c0_16], %24 {strides = array<i32>} : memref<192x256xf32, #tpu.memory_space<vmem>>, vector<32x256xf32>,
    %c32 = arith.constant 32 : index
    %c0_17 = arith.constant 0 : index
    %26 = vector.load %arg7[%c32, %c0_17] : memref<192x256xf32, #tpu.memory_space<vmem>>, vector<32x256xf32>
    tpu.vector_store %arg7[%c32, %c0_17], %22 {strides = array<i32>} : memref<192x256xf32, #tpu.memory_space<vmem>>, vector<32x256xf32>,
    %cst_18 = arith.constant 1.000000e+00 : f32
    %27 = vector.broadcast %cst_18 : f32 to vector<32x256xf32>
    %28 = arith.mulf %23, %22 : vector<32x256xf32>
    %29 = arith.subf %28, %27 : vector<32x256xf32>
    %c64 = arith.constant 64 : index
    %c0_19 = arith.constant 0 : index
    %30 = vector.load %arg7[%c64, %c0_19] : memref<192x256xf32, #tpu.memory_space<vmem>>, vector<32x256xf32>
    tpu.vector_store %arg7[%c64, %c0_19], %29 {strides = array<i32>} : memref<192x256xf32, #tpu.memory_space<vmem>>, vector<32x256xf32>,
    %31 = arith.mulf %23, %29 : vector<32x256xf32>
    %32 = arith.subf %31, %22 : vector<32x256xf32>
    %c96 = arith.constant 96 : index
    %c0_20 = arith.constant 0 : index
    %33 = vector.load %arg7[%c96, %c0_20] : memref<192x256xf32, #tpu.memory_space<vmem>>, vector<32x256xf32>
    tpu.vector_store %arg7[%c96, %c0_20], %32 {strides = array<i32>} : memref<192x256xf32, #tpu.memory_space<vmem>>, vector<32x256xf32>,
    %34 = arith.mulf %23, %32 : vector<32x256xf32>
    %35 = arith.subf %34, %29 : vector<32x256xf32>
    %c128 = arith.constant 128 : index
    %c0_21 = arith.constant 0 : index
    %36 = vector.load %arg7[%c128, %c0_21] : memref<192x256xf32, #tpu.memory_space<vmem>>, vector<32x256xf32>
    tpu.vector_store %arg7[%c128, %c0_21], %35 {strides = array<i32>} : memref<192x256xf32, #tpu.memory_space<vmem>>, vector<32x256xf32>,
    %37 = arith.mulf %23, %35 : vector<32x256xf32>
    %38 = arith.subf %37, %32 : vector<32x256xf32>
    %c160 = arith.constant 160 : index
    %c0_22 = arith.constant 0 : index
    %39 = vector.load %arg7[%c160, %c0_22] : memref<192x256xf32, #tpu.memory_space<vmem>>, vector<32x256xf32>
    tpu.vector_store %arg7[%c160, %c0_22], %38 {strides = array<i32>} : memref<192x256xf32, #tpu.memory_space<vmem>>, vector<32x256xf32>,
    %c0_23 = arith.constant 0 : index
    %c0_24 = arith.constant 0 : index
    %40 = vector.load %arg3[%c0_23, %c0_24] : memref<32x192xf32, #tpu.memory_space<vmem>>, vector<32x192xf32>
    %c0_25 = arith.constant 0 : index
    %c0_26 = arith.constant 0 : index
    %41 = vector.load %arg7[%c0_25, %c0_26] : memref<192x256xf32, #tpu.memory_space<vmem>>, vector<192x256xf32>
    %cst_27 = arith.constant dense<0.000000e+00> : vector<32x256xf32>
    %42 = tpu.matmul %40, %41, %cst_27 {dimension_numbers = #tpu.dot_dimension_numbers<[1], [0], [0], [1], [0, 0, 1, 1], [], []>} : vector<32x192xf32>, vector<192x256xf32>, vector<32x256xf32> -> vector<32x256xf32>
    %43 = math.tanh %42 : vector<32x256xf32>
    %44 = arith.addf %43, %43 : vector<32x256xf32>
    %cst_28 = arith.constant 1.000000e+00 : f32
    %45 = vector.broadcast %cst_28 : f32 to vector<32x256xf32>
    %c0_29 = arith.constant 0 : index
    %c0_30 = arith.constant 0 : index
    %46 = vector.load %arg8[%c0_29, %c0_30] : memref<192x256xf32, #tpu.memory_space<vmem>>, vector<32x256xf32>
    tpu.vector_store %arg8[%c0_29, %c0_30], %45 {strides = array<i32>} : memref<192x256xf32, #tpu.memory_space<vmem>>, vector<32x256xf32>,
    %c32_31 = arith.constant 32 : index
    %c0_32 = arith.constant 0 : index
    %47 = vector.load %arg8[%c32_31, %c0_32] : memref<192x256xf32, #tpu.memory_space<vmem>>, vector<32x256xf32>
    tpu.vector_store %arg8[%c32_31, %c0_32], %43 {strides = array<i32>} : memref<192x256xf32, #tpu.memory_space<vmem>>, vector<32x256xf32>,
    %cst_33 = arith.constant 1.000000e+00 : f32
    %48 = vector.broadcast %cst_33 : f32 to vector<32x256xf32>
    %49 = arith.mulf %44, %43 : vector<32x256xf32>
    %50 = arith.subf %49, %48 : vector<32x256xf32>
    %c64_34 = arith.constant 64 : index
    %c0_35 = arith.constant 0 : index
    %51 = vector.load %arg8[%c64_34, %c0_35] : memref<192x256xf32, #tpu.memory_space<vmem>>, vector<32x256xf32>
    tpu.vector_store %arg8[%c64_34, %c0_35], %50 {strides = array<i32>} : memref<192x256xf32, #tpu.memory_space<vmem>>, vector<32x256xf32>,
    %52 = arith.mulf %44, %50 : vector<32x256xf32>
    %53 = arith.subf %52, %43 : vector<32x256xf32>
    %c96_36 = arith.constant 96 : index
    %c0_37 = arith.constant 0 : index
    %54 = vector.load %arg8[%c96_36, %c0_37] : memref<192x256xf32, #tpu.memory_space<vmem>>, vector<32x256xf32>
    tpu.vector_store %arg8[%c96_36, %c0_37], %53 {strides = array<i32>} : memref<192x256xf32, #tpu.memory_space<vmem>>, vector<32x256xf32>,
    %55 = arith.mulf %44, %53 : vector<32x256xf32>
    %56 = arith.subf %55, %50 : vector<32x256xf32>
    %c128_38 = arith.constant 128 : index
    %c0_39 = arith.constant 0 : index
    %57 = vector.load %arg8[%c128_38, %c0_39] : memref<192x256xf32, #tpu.memory_space<vmem>>, vector<32x256xf32>
    tpu.vector_store %arg8[%c128_38, %c0_39], %56 {strides = array<i32>} : memref<192x256xf32, #tpu.memory_space<vmem>>, vector<32x256xf32>,
    %58 = arith.mulf %44, %56 : vector<32x256xf32>
    %59 = arith.subf %58, %53 : vector<32x256xf32>
    %c160_40 = arith.constant 160 : index
    %c0_41 = arith.constant 0 : index
    %60 = vector.load %arg8[%c160_40, %c0_41] : memref<192x256xf32, #tpu.memory_space<vmem>>, vector<32x256xf32>
    tpu.vector_store %arg8[%c160_40, %c0_41], %59 {strides = array<i32>} : memref<192x256xf32, #tpu.memory_space<vmem>>, vector<32x256xf32>,
    %c0_42 = arith.constant 0 : index
    %c0_43 = arith.constant 0 : index
    %61 = vector.load %arg4[%c0_42, %c0_43] : memref<1x192xf32, #tpu.memory_space<vmem>>, vector<1x192xf32>
    %c0_44 = arith.constant 0 : index
    %c0_45 = arith.constant 0 : index
    %62 = vector.load %arg8[%c0_44, %c0_45] : memref<192x256xf32, #tpu.memory_space<vmem>>, vector<192x256xf32>
    %cst_46 = arith.constant dense<0.000000e+00> : vector<1x256xf32>
    %63 = tpu.matmul %61, %62, %cst_46 {dimension_numbers = #tpu.dot_dimension_numbers<[1], [0], [0], [1], [0, 0, 1, 1], [], []>} : vector<1x192xf32>, vector<192x256xf32>, vector<1x256xf32> -> vector<1x256xf32>
    %c0_47 = arith.constant 0 : index
    %c0_48 = arith.constant 0 : index
    %64 = vector.load %arg5[%c0_47, %c0_48] : memref<1x256xf32, #tpu.memory_space<vmem>>, vector<1x256xf32>
    tpu.vector_store %arg5[%c0_47, %c0_48], %63 {strides = array<i32>} : memref<1x256xf32, #tpu.memory_space<vmem>>, vector<1x256xf32>,
    return
  }
  func.func @transform_0(%arg0: i32) -> (i32, i32) {
    %c0_i32 = arith.constant 0 : i32
    %c0_i32_0 = arith.constant 0 : i32
    return %c0_i32, %arg0 : i32, i32
  }
  func.func @transform_1(%arg0: i32) -> (i32, i32) {
    %c0_i32 = arith.constant 0 : i32
    %c0_i32_0 = arith.constant 0 : i32
    %c0_i32_1 = arith.constant 0 : i32
    return %c0_i32, %c0_i32_0 : i32, i32
  }
  func.func @transform_2(%arg0: i32) -> (i32, i32) {
    %c0_i32 = arith.constant 0 : i32
    %c0_i32_0 = arith.constant 0 : i32
    %c0_i32_1 = arith.constant 0 : i32
    return %c0_i32, %c0_i32_0 : i32, i32
  }
  func.func @transform_3(%arg0: i32) -> (i32, i32) {
    %c0_i32 = arith.constant 0 : i32
    %c0_i32_0 = arith.constant 0 : i32
    %c0_i32_1 = arith.constant 0 : i32
    return %c0_i32, %c0_i32_0 : i32, i32
  }
  func.func @transform_4(%arg0: i32) -> (i32, i32) {
    %c0_i32 = arith.constant 0 : i32
    %c0_i32_0 = arith.constant 0 : i32
    return %c0_i32, %arg0 : i32, i32
  }
}

</mosaic_0001>

<bundles_post_ra>
// kernel: tpu_custom_call.1
= control target key start
LH: loop header
LB: loop body
LE: loop exit
PB: predicated region body
PF: predicated region fallthrough
CT: control target
= control target key end

     0   :  { %9 = vsyncpa [#allocation6], 0  ;;  %s1229_s0 = inlined_call_operand.vmem [shape: f32[2,256], index: 0, kind: input, shape index: {}]   ;;  %s1230_s1 = inlined_call_operand.vmem [shape: f32[32,12], index: 1, kind: input, shape index: {}]   ;;  %s1231_s2 = inlined_call_operand.hbm [shape: f32[32,192], index: 2, kind: input, shape index: {}]   ;;  %s1232_s3 = inlined_call_operand.vmem [shape: f32[1,192], index: 3, kind: input, shape index: {}]   ;;  %s1233_s4 = inlined_call_operand.hbm [shape: f32[1,256], index: 4, kind: output, shape index: {}]  }
   0x1   :  { %10 = vsyncpa [#allocation7], 0  ;;  %s1033_s15 = smov [#allocation5]   ;;  %s985_s19 = scalar_lea.hbm %s1231_s2, 1024 }
   0x2   :  { %s20_s16 = sshll.u32 %s1033_s15, 4  ;;  %p986_p0 = scmp.ne.s32.totalorder %s1231_s2, %s985_s19  ;;  %s21_s16 = int_to_ptr.vmem [resolvable:$true] %s20_s16 }
   0x3   :  { %p989_p1 = scmp.lt.u32.totalorder %s985_s19, %s1231_s2 }
   0x5   :  { %p991_p2 = pnand %p989_p1, %p986_p0 }
   0x7   :  { %994 = shalt.err (!%p991_p2)
}
   0x8   :  { %s995_s24 = scalar_lea.vmem %s21_s16, 1024  ;;  %p1000_p4 = scmp.lt.s32.totalorder %s21_s16, %s21_s16 }
   0x9   :  { %p996_p3 = scmp.ne.s32.totalorder %s21_s16, %s995_s24  ;;  %p1001_p5 = scmp.lt.s32.totalorder %s995_s24, %s995_s24 }
   0xb   :  { %p1002_p6 = por %p1001_p5, %p1000_p4 }
   0xd   :  { %p1003_p7 = pnand %p1002_p6, %p996_p3 }
   0xf   :  { %1006 = shalt.err (!%p1003_p7)
}
  0x10   :  { %s1034_s25 = smov 256   ;;  %s1035_s26 = smov 16  }
  0x11   :  { %26 = dma.hbm_to_vmem [thread:$0]  %s1231_s2, 1024, %s21_s16, [#allocation6], %s1034_s25, %s1034_s25, %s1035_s26  }
  0x12   :  { %1029 = dma.done.wait [#allocation6], 1024  }
  0x13   :  { %1030 = vsyncadd [#allocation6], 4294966272  ;;  %v1036_v0 = vmov 1.0   ;;  %v1037_v1 = vmov 0.0   ;;  %v32_v2 = vld [vmem:[%s1229_s0] sm:$0xf]  ;;  %v42_v5 = vlaneseq }
  0x14   :  { %35 = vst [vmem:[#allocation2] sm:$0x3] %v1036_v0  ;;  %36 = vst [vmem:[#allocation2 + $0x8] sm:$0x3] %v1036_v0  ;;  %205 = vmatprep.mubr.f32.mxu0 %v1037_v1  ;;  %951 = vtanh.f32 %v32_v2  ;;  %v1038_v3 = vmov 1983009808  }
  0x15   :  { %v40_v4 = vunpack.c.l.s4 %v1038_v3  ;;  %v1085_v7 = vshrl.u32 %v42_v5, 7  ;;  %vm134_vm0 = vcmask 1043456   ;;  %vm1039_vm1 = vmmov 1   ;;  %v113_v38 = vld [vmem:[%s1230_s1] sm:$0xff]  ;;  %v114_v39 = vld [vmem:[%s1230_s1 + $0x8] sm:$0xff]  ;;  %v115_v40 = vld [vmem:[%s1230_s1 + $0x10] sm:$0xff] }
  0x16   :  { %vm848_vm2 = vmpackc.low %vm134_vm0, %vm1039_vm1  ;;  %vm121_vm3 = vcmask 97280   ;;  %v116_v41 = vld [vmem:[%s1230_s1 + $0x18] sm:$0xff]  ;;  %v1040_v42 = vmov 1.0|1.0   ;;  %v359_v43 = vld [vmem:[#allocation5 + $0x8] sm:$0xff]  ;;  %vm414_vm4 = vcmask 523264  }
  0x17   :  { %v41_v6 = vunpack.c.0.s8 %v40_v4  ;;  %853 = vmatprep.subr.bf16.mxu1 %v1040_v42  ;;  %834 = vmatprep.mubr.msk.f32.mxu1 %vm414_vm4, %v359_v43  ;;  %vm796_vm5 = vcmp.lt.s32.totalorder %v42_v5, 256 }
  0x18   :  { %854 = vmatpush1.bf16.msra.mxu1 %v1040_v42 }
  0x19   :  { %v44_v8 = vsub.s32 %v41_v6, %v1085_v7  ;;  %855 = vmatprep.subr.bf16.mxu1 %v1040_v42 }
  0x1c   :  { %856 = vmatpush1.bf16.msra.mxu1 %v1040_v42 }
  0x1e   :  { %v952_v9 = vpop.eup %951 }
  0x1f   :  { %v34_v10 = vadd.f32 %v952_v9, %v952_v9  ;;  %v38_v11 = vcombine.low %v952_v9, %v952_v9 }
  0x21   :  { %v45_v12 = vrot.slane %v38_v11, %v44_v8  ;;  %v51_v13 = vmul.f32 %v952_v9, %v34_v10  ;;  %814 = vst.sshfl [vmem:[#allocation2] sm:$0x30 pattern:$0x76325410] %v38_v11 }
  0x23   :  { %v46_v14 = vcombine.high %v45_v12, %v45_v12  ;;  %v815_v15 = vadd.f32 -1.0, %v51_v13 }
  0x25   :  { %50 = vst [vmem:[#allocation2 + $0x8] sm:$0xc] %v46_v14  ;;  %816 = vst.sshfl [vmem:[#allocation2 + $0x8] sm:$0xc pattern:$0x76325410] %v815_v15  ;;  %v66_v16 = vmul.f32 %v815_v15, %v34_v10  ;;  %v60_v17 = vrot.slane %v815_v15, %v44_v8 }
  0x27   :  { %v67_v18 = vsub.f32 %v66_v16, %v952_v9  ;;  %v61_v19 = vcombine.low %v60_v17, %v60_v17 }
  0x29   :  { %v69_v20 = vcombine.low %v67_v18, %v67_v18  ;;  %v82_v21 = vmul.f32 %v67_v18, %v34_v10  ;;  %64 = vst [vmem:[#allocation2] sm:$0x30] %v61_v19 }
  0x2b   :  { %v76_v22 = vrot.slane %v69_v20, %v44_v8  ;;  %817 = vst.sshfl [vmem:[#allocation2 + $0x8] sm:$0xc0 pattern:$0x76325410] %v69_v20  ;;  %v83_v23 = vsub.f32 %v82_v21, %v815_v15 }
  0x2d   :  { %v91_v24 = vrot.slane %v83_v23, %v44_v8  ;;  %v97_v25 = vmul.f32 %v83_v23, %v34_v10  ;;  %818 = vst.sshfl [vmem:[#allocation2 + $0x10] sm:$0x3 pattern:$0x76325410] %v83_v23  ;;  %v77_v26 = vcombine.low %v76_v22, %v76_v22 }
  0x2f   :  { %v92_v27 = vcombine.high %v91_v24, %v91_v24  ;;  %v98_v28 = vsub.f32 %v97_v25, %v67_v18  ;;  %80 = vst [vmem:[#allocation2] sm:$0xc0] %v77_v26 }
  0x31   :  { %96 = vst [vmem:[#allocation2 + $0x18] sm:$0x3] %v92_v27  ;;  %v100_v29 = vcombine.low %v98_v28, %v98_v28 }
  0x32   :  { %v118_v34 = vld [vmem:[#allocation2 + $0x8] sm:$0xff] }
  0x33   :  { %v107_v30 = vrot.slane %v100_v29, %v44_v8  ;;  %819 = vst.sshfl [vmem:[#allocation2 + $0x10] sm:$0x30 pattern:$0x76325410] %v100_v29 }
  0x35   :  { %v108_v31 = vcombine.high %v107_v30, %v107_v30 }
  0x36   :  { %v117_v32 = vld [vmem:[#allocation2] sm:$0xff] }
  0x37   :  { %112 = vst [vmem:[#allocation2 + $0x18] sm:$0xc] %v108_v31 }
  0x3a   :  { %v119_v33 = vld [vmem:[#allocation2 + $0x10] sm:$0xf] }
  0x3b   :  { %v850_v36 = vpack.c.bf16 %v119_v33, %v117_v32 }
  0x3e   :  { %v120_v35 = vld [vmem:[#allocation2 + $0x18] sm:$0xf] }
  0x3f   :  { %v847_v37 = vpack.c.bf16 %v120_v35, %v118_v34 }
  0x41   :  { %849 = vmatprep.subr.msk.bf16.mxu0 %vm848_vm2, %v847_v37 }
  0x42   :  { %852 = vmatpush1.bf16.msk.msra.mxu0 %vm848_vm2, %v850_v36 }
  0x43   :  { %897 = vmatprep.subr.bf16.mxu0 %v1040_v42 }
  0x45   :  { %822 = vmatmul.mubr.msk.f32.vlgmr.msra.gmra.mrb[0].mxu0 %vm121_vm3, %v113_v38 }
  0x46   :  { %211 = vmatprep.mubr.f32.mxu0 %v1037_v1  ;;  %898 = vmatpush1.bf16.msra.mxu0 %v1040_v42 }
  0x47   :  { %899 = vmatprep.subr.bf16.mxu0 %v1040_v42 }
  0x49   :  { %823 = vmatmul.mubr.msk.f32.gmra.mrb[2].mxu0 %vm121_vm3, %v114_v39 }
  0x4a   :  { %217 = vmatprep.mubr.f32.mxu0 %v1037_v1  ;;  %900 = vmatpush1.bf16.msra.mxu0 %v1040_v42 }
  0x4d   :  { %824 = vmatmul.mubr.msk.f32.gmra.mrb[4].mxu0 %vm121_vm3, %v115_v40 }
  0x4e   :  { %223 = vmatprep.mubr.f32.mxu0 %v1037_v1 }
  0x51   :  { %825 = vmatmul.mubr.msk.f32.gmra.mrb[6].mxu0 %vm121_vm3, %v116_v41 }
 0x118   :  { %v207_v44 = vpop.f32.mrb[0].mxu0 }
 0x119   :  { %953 = vtanh.f32 %v207_v44  ;;  %v209_v45 = vpop.f32.mrb[1].mxu0 }
 0x11a   :  { %955 = vtanh.f32 %v209_v45 }
 0x11c   :  { %v213_v46 = vpop.f32.mrb[2].mxu0 }
 0x11d   :  { %957 = vtanh.f32 %v213_v46  ;;  %v215_v47 = vpop.f32.mrb[3].mxu0 }
 0x11e   :  { %959 = vtanh.f32 %v215_v47 }
 0x120   :  { %v219_v48 = vpop.f32.mrb[4].mxu0 }
 0x121   :  { %961 = vtanh.f32 %v219_v48  ;;  %v221_v49 = vpop.f32.mrb[5].mxu0 }
 0x122   :  { %963 = vtanh.f32 %v221_v49 }
 0x123   :  { %v954_v50 = vpop.eup %953 }
 0x124   :  { %v956_v51 = vpop.eup %955  ;;  %v225_v52 = vpop.f32.mrb[6].mxu0  ;;  %v1104_v53 = vadd.f32 %v954_v50, %v954_v50 }
 0x125   :  { %965 = vtanh.f32 %v225_v52  ;;  %v227_v54 = vpop.f32.mrb[7].mxu0  ;;  %v239_v55 = vadd.f32 %v956_v51, %v956_v51 }
 0x126   :  { %967 = vtanh.f32 %v227_v54  ;;  %v262_v56 = vmul.f32 %v954_v50, %v1104_v53 }
 0x127   :  { %v958_v57 = vpop.eup %957  ;;  %v263_v58 = vmul.f32 %v956_v51, %v239_v55 }
 0x128   :  { %v960_v59 = vpop.eup %959  ;;  %v859_v60 = vpack.c.bf16 %v958_v57, %v954_v50  ;;  %v1107_v61 = vadd.f32 %v958_v57, %v958_v57  ;;  %v1109_v62 = vadd.f32 -1.0, %v262_v56 }
 0x129   :  { %v857_v63 = vpack.c.bf16 %v960_v59, %v956_v51  ;;  %v1111_v0 = vadd.f32 %v960_v59, %v960_v59  ;;  %v827_v1 = vadd.f32 -1.0, %v263_v58 }
 0x12a   :  { %v264_v2 = vmul.f32 %v958_v57, %v1107_v61  ;;  %v286_v3 = vmul.f32 %v1109_v62, %v1104_v53 }
 0x12b   :  { %v962_v4 = vpop.eup %961  ;;  %858 = vmatprep.subr.bf16.mxu1 %v857_v63  ;;  %v265_v6 = vmul.f32 %v960_v59, %v1111_v0  ;;  %v287_v8 = vmul.f32 %v827_v1, %v239_v55 }
 0x12c   :  { %v964_v9 = vpop.eup %963  ;;  %860 = vmatpush1.bf16.msra.mxu1 %v859_v60  ;;  %v828_v10 = vadd.f32 -1.0, %v264_v2  ;;  %v1117_v11 = vadd.f32 %v962_v4, %v962_v4  ;;  %v1119_v12 = vsub.f32 %v286_v3, %v954_v50 }
 0x12d   :  { %v829_v13 = vadd.f32 -1.0, %v265_v6  ;;  %v1121_v14 = vadd.f32 %v964_v9, %v964_v9  ;;  %v1123_v15 = vsub.f32 %v287_v8, %v956_v51 }
 0x12e   :  { %v867_v16 = vpack.c.bf16 %v828_v10, %v1109_v62  ;;  %v266_v17 = vmul.f32 %v962_v4, %v1117_v11  ;;  %v288_v18 = vmul.f32 %v828_v10, %v1107_v61  ;;  %v310_v19 = vmul.f32 %v1119_v12, %v1104_v53 }
 0x12f   :  { %v966_v20 = vpop.eup %965  ;;  %v865_v21 = vpack.c.bf16 %v829_v13, %v827_v1  ;;  %v267_v22 = vmul.f32 %v964_v9, %v1121_v14  ;;  %v289_v23 = vmul.f32 %v829_v13, %v1111_v0  ;;  %v311_v24 = vmul.f32 %v1123_v15, %v239_v55 }
 0x130   :  { %v968_v25 = vpop.eup %967  ;;  %v863_v26 = vpack.c.bf16 %v966_v20, %v962_v4  ;;  %v244_v27 = vadd.f32 %v966_v20, %v966_v20  ;;  %v830_v28 = vadd.f32 -1.0, %v266_v17  ;;  %v296_v29 = vsub.f32 %v288_v18, %v958_v57 }
 0x131   :  { %v861_v30 = vpack.c.bf16 %v968_v25, %v964_v9  ;;  %v245_v31 = vadd.f32 %v968_v25, %v968_v25  ;;  %v831_v32 = vadd.f32 -1.0, %v267_v22  ;;  %v297_v33 = vsub.f32 %v289_v23, %v960_v59 }
 0x132   :  { %v268_v34 = vmul.f32 %v966_v20, %v244_v27  ;;  %v875_v35 = vpack.c.bf16 %v296_v29, %v1119_v12  ;;  %v290_v36 = vmul.f32 %v830_v28, %v1117_v11  ;;  %v1135_v37 = vsub.f32 %v311_v24, %v827_v1 }
 0x133   :  { %862 = vmatprep.subr.bf16.mxu1 %v861_v30  ;;  %v269_v38 = vmul.f32 %v968_v25, %v245_v31  ;;  %v873_v39 = vpack.c.bf16 %v297_v33, %v1123_v15  ;;  %v291_v40 = vmul.f32 %v831_v32, %v1121_v14  ;;  %v313_v41 = vmul.f32 %v297_v33, %v1111_v0 }
 0x134   :  { %864 = vmatpush1.bf16.msra.mxu1 %v863_v26  ;;  %v832_v42 = vadd.f32 -1.0, %v268_v34  ;;  %v298_v43 = vsub.f32 %v290_v36, %v962_v4  ;;  %v312_v44 = vmul.f32 %v296_v29, %v1107_v61  ;;  %v318_v45 = vsub.f32 %v310_v19, %v1109_v62  ;;  %v364_v34 = vld [vmem:[#allocation5 + $0x30] sm:$0xff] }
 0x135   :  { %866 = vmatprep.subr.bf16.mxu1 %v865_v21  ;;  %v833_v46 = vadd.f32 -1.0, %v269_v38  ;;  %v299_v47 = vsub.f32 %v291_v40, %v964_v9  ;;  %v321_v48 = vsub.f32 %v313_v41, %v829_v13  ;;  %v335_v49 = vmul.f32 %v1135_v37, %v239_v55 }
 0x136   :  { %v871_v50 = vpack.c.bf16 %v832_v42, %v830_v28  ;;  %v292_v51 = vmul.f32 %v832_v42, %v244_v27  ;;  %v320_v52 = vsub.f32 %v312_v44, %v828_v10  ;;  %v314_v54 = vmul.f32 %v298_v43, %v1117_v11 }
 0x137   :  { %v869_v56 = vpack.c.bf16 %v833_v46, %v831_v32  ;;  %v293_v57 = vmul.f32 %v833_v46, %v245_v31  ;;  %v881_v58 = vpack.c.bf16 %v321_v48, %v1135_v37  ;;  %v315_v59 = vmul.f32 %v299_v47, %v1121_v14 }
 0x138   :  { %868 = vmatpush1.bf16.msra.mxu1 %v867_v16  ;;  %v300_v60 = vsub.f32 %v292_v51, %v966_v20  ;;  %v883_v62 = vpack.c.bf16 %v320_v52, %v318_v45  ;;  %v322_v63 = vsub.f32 %v314_v54, %v830_v28  ;;  %v337_v1 = vmul.f32 %v321_v48, %v1111_v0 }
 0x139   :  { %870 = vmatprep.subr.bf16.mxu1 %v869_v56  ;;  %v301_v2 = vsub.f32 %v293_v57, %v968_v25  ;;  %v323_v55 = vsub.f32 %v315_v59, %v831_v32  ;;  %v343_v3 = vsub.f32 %v335_v49, %v1123_v15  ;;  %v334_v4 = vmul.f32 %v318_v45, %v1104_v53 }
 0x13a   :  { %v879_v6 = vpack.c.bf16 %v300_v60, %v298_v43  ;;  %v316_v8 = vmul.f32 %v300_v60, %v244_v27  ;;  %v345_v9 = vsub.f32 %v337_v1, %v297_v33  ;;  %v336_v10 = vmul.f32 %v320_v52, %v1107_v61  ;;  %v365_v33 = vld [vmem:[#allocation5 + $0x38] sm:$0xff] }
 0x13b   :  { %v877_v13 = vpack.c.bf16 %v301_v2, %v299_v47  ;;  %v317_v17 = vmul.f32 %v301_v2, %v245_v31  ;;  %v342_v16 = vsub.f32 %v334_v4, %v1119_v12  ;;  %v338_v20 = vmul.f32 %v322_v63, %v1117_v11  ;;  %v358_v11 = vld [vmem:[#allocation5] sm:$0xff] }
 0x13c   :  { %872 = vmatpush1.bf16.msra.mxu1 %v871_v50  ;;  %v324_v18 = vsub.f32 %v316_v8, %v832_v42  ;;  %v889_v19 = vpack.c.bf16 %v345_v9, %v343_v3  ;;  %v344_v0 = vsub.f32 %v336_v10, %v296_v29  ;;  %v339_v15 = vmul.f32 %v323_v55, %v1121_v14  ;;  %v361_v14 = vld [vmem:[#allocation5 + $0x18] sm:$0xff]  ;;  %v363_v29 = vld [vmem:[#allocation5 + $0x28] sm:$0xff] }
 0x13d   :  { %874 = vmatprep.subr.bf16.mxu1 %v873_v39  ;;  %v325_v21 = vsub.f32 %v317_v17, %v833_v46  ;;  %v346_v61 = vsub.f32 %v338_v20, %v298_v43  ;;  %v700_v36 = vsub.s32 1, %v1085_v7 }
 0x13e   :  { %v887_v53 = vpack.c.bf16 %v324_v18, %v322_v63  ;;  %v891_v22 = vpack.c.bf16 %v344_v0, %v342_v16  ;;  %v340_v23 = vmul.f32 %v324_v18, %v244_v27  ;;  %v347_v12 = vsub.f32 %v339_v15, %v299_v47  ;;  %v360_v27 = vld [vmem:[#allocation5 + $0x10] sm:$0xff] }
 0x13f   :  { %v885_v24 = vpack.c.bf16 %v325_v21, %v323_v55  ;;  %v341_v25 = vmul.f32 %v325_v21, %v245_v31  ;;  %v362_v31 = vld [vmem:[#allocation5 + $0x20] sm:$0xff] }
 0x140   :  { %876 = vmatpush1.bf16.msra.mxu1 %v875_v35  ;;  %v348_v26 = vsub.f32 %v340_v23, %v300_v60  ;;  %v1159_v35 = vld [vmem:[%s1232_s3] sm:$0x3]  ;;  %s1042_s3 = smov [#allocation8]  }
 0x141   :  { %878 = vmatprep.subr.bf16.mxu1 %v877_v13  ;;  %v349_v28 = vsub.f32 %v341_v25, %v301_v2  ;;  %v701_v37 = vrot.slane %v1159_v35, %v700_v36  ;;  %s805_s12 = sshll.u32 %s1042_s3, 4  ;;  %s806_s12 = int_to_ptr.vmem [resolvable:$true] %s805_s12 }
 0x142   :  { %v895_v30 = vpack.c.bf16 %v348_v26, %v346_v61  ;;  %s1007_s13 = scalar_lea.vmem %s806_s12, 32  ;;  %p1012_p9 = scmp.lt.s32.totalorder %s806_s12, %s806_s12 }
 0x143   :  { %v893_v32 = vpack.c.bf16 %v349_v28, %v347_v12  ;;  %846 = vmatprep.mubr.msk.f32.mxu0 %vm414_vm4, %v701_v37  ;;  %p1008_p8 = scmp.ne.s32.totalorder %s806_s12, %s1007_s13  ;;  %p1013_p10 = scmp.lt.s32.totalorder %s1007_s13, %s1007_s13 }
 0x144   :  { %880 = vmatpush1.bf16.msra.mxu1 %v879_v6 }
 0x145   :  { %882 = vmatprep.subr.bf16.mxu1 %v881_v58  ;;  %p1014_p11 = por %p1013_p10, %p1012_p9 }
 0x147   :  { %p1015_p12 = pnand %p1014_p11, %p1008_p8 }
 0x148   :  { %884 = vmatpush1.bf16.msra.mxu1 %v883_v62 }
 0x149   :  { %886 = vmatprep.subr.bf16.mxu1 %v885_v24 }
 0x14c   :  { %888 = vmatpush1.bf16.msra.mxu1 %v887_v53 }
 0x14d   :  { %890 = vmatprep.subr.bf16.mxu1 %v889_v19 }
 0x150   :  { %892 = vmatpush1.bf16.msra.mxu1 %v891_v22 }
 0x151   :  { %894 = vmatprep.subr.bf16.mxu1 %v893_v32 }
 0x154   :  { %896 = vmatpush1.bf16.msra.mxu1 %v895_v30 }
 0x157   :  { %492 = vmatmul.mubr.f32.vlgmr.msra.gmra.mrb[0].mxu1 %v358_v11 }
 0x158   :  { %835 = vmatprep.mubr.msk.f32.mxu1 %vm414_vm4, %v361_v14 }
 0x15b   :  { %498 = vmatmul.mubr.f32.gmra.mrb[2].mxu1 %v360_v27 }
 0x15c   :  { %836 = vmatprep.mubr.msk.f32.mxu1 %vm414_vm4, %v363_v29 }
 0x15f   :  { %504 = vmatmul.mubr.f32.gmra.mrb[4].mxu1 %v362_v31 }
 0x160   :  { %837 = vmatprep.mubr.msk.f32.mxu1 %vm414_vm4, %v365_v33 }
 0x163   :  { %510 = vmatmul.mubr.f32.gmra.mrb[6].mxu1 %v364_v34 }
 0x22a   :  { %v493_v38 = vpop.f32.mrb[0].mxu1 }
 0x22b   :  { %969 = vtanh.f32 %v493_v38  ;;  %v495_v39 = vpop.f32.mrb[1].mxu1 }
 0x22c   :  { %971 = vtanh.f32 %v495_v39 }
 0x22e   :  { %v499_v40 = vpop.f32.mrb[2].mxu1 }
 0x22f   :  { %973 = vtanh.f32 %v499_v40  ;;  %v501_v41 = vpop.f32.mrb[3].mxu1 }
 0x230   :  { %975 = vtanh.f32 %v501_v41 }
 0x232   :  { %v505_v42 = vpop.f32.mrb[4].mxu1 }
 0x233   :  { %977 = vtanh.f32 %v505_v42  ;;  %v507_v43 = vpop.f32.mrb[5].mxu1 }
 0x234   :  { %979 = vtanh.f32 %v507_v43 }
 0x235   :  { %v970_v44 = vpop.eup %969 }
 0x236   :  { %v972_v45 = vpop.eup %971  ;;  %v511_v46 = vpop.f32.mrb[6].mxu1  ;;  %v1164_v47 = vadd.f32 %v970_v44, %v970_v44 }
 0x237   :  { %981 = vtanh.f32 %v511_v46  ;;  %v513_v48 = vpop.f32.mrb[7].mxu1  ;;  %v525_v49 = vadd.f32 %v972_v45, %v972_v45 }
 0x238   :  { %983 = vtanh.f32 %v513_v48  ;;  %v548_v50 = vmul.f32 %v970_v44, %v1164_v47 }
 0x239   :  { %v974_v51 = vpop.eup %973  ;;  %v549_v52 = vmul.f32 %v972_v45, %v525_v49 }
 0x23a   :  { %v976_v54 = vpop.eup %975  ;;  %v903_v56 = vpack.c.bf16 %v974_v51, %v970_v44  ;;  %v1167_v57 = vadd.f32 %v974_v51, %v974_v51  ;;  %v1169_v58 = vadd.f32 -1.0, %v548_v50 }
 0x23b   :  { %v901_v59 = vpack.c.bf16 %v976_v54, %v972_v45  ;;  %v1171_v60 = vadd.f32 %v976_v54, %v976_v54  ;;  %v839_v62 = vadd.f32 -1.0, %v549_v52 }
 0x23c   :  { %v550_v63 = vmul.f32 %v974_v51, %v1167_v57  ;;  %v572_v1 = vmul.f32 %v1169_v58, %v1164_v47 }
 0x23d   :  { %v978_v2 = vpop.eup %977  ;;  %902 = vmatprep.subr.bf16.mxu0 %v901_v59  ;;  %v551_v55 = vmul.f32 %v976_v54, %v1171_v60  ;;  %v573_v3 = vmul.f32 %v839_v62, %v525_v49 }
 0x23e   :  { %v980_v4 = vpop.eup %979  ;;  %904 = vmatpush1.bf16.msra.mxu0 %v903_v56  ;;  %v840_v6 = vadd.f32 -1.0, %v550_v63  ;;  %v1177_v8 = vadd.f32 %v978_v2, %v978_v2  ;;  %v1179_v9 = vsub.f32 %v572_v1, %v970_v44 }
 0x23f   :  { %v841_v10 = vadd.f32 -1.0, %v551_v55  ;;  %v1181_v13 = vadd.f32 %v980_v4, %v980_v4  ;;  %v1183_v17 = vsub.f32 %v573_v3, %v972_v45 }
 0x240   :  { %v911_v16 = vpack.c.bf16 %v840_v6, %v1169_v58  ;;  %v552_v18 = vmul.f32 %v978_v2, %v1177_v8  ;;  %v574_v19 = vmul.f32 %v840_v6, %v1167_v57  ;;  %v596_v0 = vmul.f32 %v1179_v9, %v1164_v47 }
 0x241   :  { %v982_v20 = vpop.eup %981  ;;  %v909_v21 = vpack.c.bf16 %v841_v10, %v839_v62  ;;  %v553_v15 = vmul.f32 %v980_v4, %v1181_v13  ;;  %v575_v53 = vmul.f32 %v841_v10, %v1171_v60  ;;  %v597_v22 = vmul.f32 %v1183_v17, %v525_v49 }
 0x242   :  { %v984_v23 = vpop.eup %983  ;;  %v907_v24 = vpack.c.bf16 %v982_v20, %v978_v2  ;;  %v530_v25 = vadd.f32 %v982_v20, %v982_v20  ;;  %v842_v61 = vadd.f32 -1.0, %v552_v18  ;;  %v582_v26 = vsub.f32 %v574_v19, %v974_v51 }
 0x243   :  { %v905_v12 = vpack.c.bf16 %v984_v23, %v980_v4  ;;  %v531_v28 = vadd.f32 %v984_v23, %v984_v23  ;;  %v843_v30 = vadd.f32 -1.0, %v553_v15  ;;  %v583_v32 = vsub.f32 %v575_v53, %v976_v54 }
 0x244   :  { %v554_v11 = vmul.f32 %v982_v20, %v530_v25  ;;  %v919_v14 = vpack.c.bf16 %v582_v26, %v1179_v9  ;;  %v576_v27 = vmul.f32 %v842_v61, %v1177_v8  ;;  %v1195_v29 = vsub.f32 %v597_v22, %v839_v62 }
 0x245   :  { %906 = vmatprep.subr.bf16.mxu0 %v905_v12  ;;  %v555_v31 = vmul.f32 %v984_v23, %v531_v28  ;;  %v917_v33 = vpack.c.bf16 %v583_v32, %v1183_v17  ;;  %v577_v34 = vmul.f32 %v843_v30, %v1181_v13  ;;  %v599_v36 = vmul.f32 %v583_v32, %v1171_v60 }
 0x246   :  { %908 = vmatpush1.bf16.msra.mxu0 %v907_v24  ;;  %v844_v37 = vadd.f32 -1.0, %v554_v11  ;;  %v584_v38 = vsub.f32 %v576_v27, %v978_v2  ;;  %v598_v39 = vmul.f32 %v582_v26, %v1167_v57  ;;  %v604_v40 = vsub.f32 %v596_v0, %v1169_v58 }
 0x247   :  { %910 = vmatprep.subr.bf16.mxu0 %v909_v21  ;;  %v845_v41 = vadd.f32 -1.0, %v555_v31  ;;  %v585_v42 = vsub.f32 %v577_v34, %v980_v4  ;;  %v607_v43 = vsub.f32 %v599_v36, %v841_v10  ;;  %v621_v44 = vmul.f32 %v1195_v29, %v525_v49 }
 0x248   :  { %v915_v45 = vpack.c.bf16 %v844_v37, %v842_v61  ;;  %v578_v46 = vmul.f32 %v844_v37, %v530_v25  ;;  %v606_v48 = vsub.f32 %v598_v39, %v840_v6  ;;  %v600_v50 = vmul.f32 %v584_v38, %v1177_v8 }
 0x249   :  { %v913_v51 = vpack.c.bf16 %v845_v41, %v843_v30  ;;  %v579_v52 = vmul.f32 %v845_v41, %v531_v28  ;;  %v925_v54 = vpack.c.bf16 %v607_v43, %v1195_v29  ;;  %v601_v56 = vmul.f32 %v585_v42, %v1181_v13 }
 0x24a   :  { %912 = vmatpush1.bf16.msra.mxu0 %v911_v16  ;;  %v586_v59 = vsub.f32 %v578_v46, %v982_v20  ;;  %v927_v58 = vpack.c.bf16 %v606_v48, %v604_v40  ;;  %v608_v62 = vsub.f32 %v600_v50, %v842_v61  ;;  %v623_v63 = vmul.f32 %v607_v43, %v1171_v60 }
 0x24b   :  { %914 = vmatprep.subr.bf16.mxu0 %v913_v51  ;;  %v587_v1 = vsub.f32 %v579_v52, %v984_v23  ;;  %v609_v49 = vsub.f32 %v601_v56, %v843_v30  ;;  %v629_v2 = vsub.f32 %v621_v44, %v1183_v17  ;;  %v620_v55 = vmul.f32 %v604_v40, %v1164_v47 }
 0x24c   :  { %v923_v3 = vpack.c.bf16 %v586_v59, %v584_v38  ;;  %v602_v4 = vmul.f32 %v586_v59, %v530_v25  ;;  %v631_v6 = vsub.f32 %v623_v63, %v583_v32  ;;  %v622_v10 = vmul.f32 %v606_v48, %v1167_v57 }
 0x24d   :  { %v921_v18 = vpack.c.bf16 %v587_v1, %v585_v42  ;;  %v603_v19 = vmul.f32 %v587_v1, %v531_v28  ;;  %v628_v16 = vsub.f32 %v620_v55, %v1179_v9  ;;  %v624_v21 = vmul.f32 %v608_v62, %v1177_v8 }
 0x24e   :  { %916 = vmatpush1.bf16.msra.mxu0 %v915_v45  ;;  %v610_v0 = vsub.f32 %v602_v4, %v844_v37  ;;  %v933_v20 = vpack.c.bf16 %v631_v6, %v629_v2  ;;  %v630_v60 = vsub.f32 %v622_v10, %v582_v26  ;;  %v625_v17 = vmul.f32 %v609_v49, %v1181_v13 }
 0x24f   :  { %918 = vmatprep.subr.bf16.mxu0 %v917_v33  ;;  %v611_v15 = vsub.f32 %v603_v19, %v845_v41  ;;  %v632_v57 = vsub.f32 %v624_v21, %v584_v38  ;;  %v696_v8 = vsub.s32 0, %v1085_v7 }
 0x250   :  { %v931_v47 = vpack.c.bf16 %v610_v0, %v608_v62  ;;  %v935_v53 = vpack.c.bf16 %v630_v60, %v628_v16  ;;  %v626_v22 = vmul.f32 %v610_v0, %v530_v25  ;;  %v633_v9 = vsub.f32 %v625_v17, %v585_v42 }
 0x251   :  { %v929_v23 = vpack.c.bf16 %v611_v15, %v609_v49  ;;  %v627_v24 = vmul.f32 %v611_v15, %v531_v28  ;;  %v697_v13 = vrot.slane %v1159_v35, %v696_v8  ;;  %v1041_v25 = vmov 1966171168  }
 0x252   :  { %920 = vmatpush1.bf16.msra.mxu0 %v919_v14  ;;  %v634_v61 = vsub.f32 %v626_v22, %v586_v59  ;;  %v780_v26 = vunpack.c.l.s4 %v1041_v25 }
 0x253   :  { %922 = vmatprep.subr.bf16.mxu0 %v921_v18  ;;  %v635_v12 = vsub.f32 %v627_v24, %v587_v1 }
 0x254   :  { %v939_v30 = vpack.c.bf16 %v634_v61, %v632_v57  ;;  %v781_v28 = vunpack.c.0.s8 %v780_v26 }
 0x255   :  { %v937_v32 = vpack.c.bf16 %v635_v12, %v633_v9 }
 0x256   :  { %924 = vmatpush1.bf16.msra.mxu0 %v923_v3  ;;  %v784_v14 = vsub.s32 %v781_v28, %v1085_v7 }
 0x257   :  { %926 = vmatprep.subr.bf16.mxu0 %v925_v54 }
 0x25a   :  { %928 = vmatpush1.bf16.msra.mxu0 %v927_v58 }
 0x25b   :  { %930 = vmatprep.subr.bf16.mxu0 %v929_v23 }
 0x25e   :  { %932 = vmatpush1.bf16.msra.mxu0 %v931_v47 }
 0x25f   :  { %934 = vmatprep.subr.bf16.mxu0 %v933_v20 }
 0x262   :  { %936 = vmatpush1.bf16.msra.mxu0 %v935_v53 }
 0x263   :  { %938 = vmatprep.subr.bf16.mxu0 %v937_v32 }
 0x266   :  { %940 = vmatpush1.bf16.msra.mxu0 %v939_v30 }
 0x269   :  { %770 = vmatmul.mubr.f32.vlgmr.msra.gmra.mrb[8].mxu0 %v697_v13 }
 0x33c   :  { %v771_v11 = vpop.f32.mrb[8].mxu0 }
 0x33d   :  { %v773_v27 = vpop.f32.mrb[9].mxu0 }
 0x33e   :  { %v778_v29 = vcombine.low %v771_v11, %v773_v27 }
 0x340   :  { %v785_v31 = vrot.slane %v778_v29, %v784_v14 }
 0x342   :  { %v792_v33 = vrot.slane %v785_v31, %v784_v14 }
 0x344   :  { %798 = vst.msk [vmem:[#allocation8] sm:$0x3] %vm796_vm5, %v792_v33 }
 0x345   :  { %1018 = shalt.err (!%p1015_p12)
}
 0x346   :  { %s1019_s16 = scalar_lea.hbm %s1233_s4, 32 }
 0x347   :  { %p1020_p13 = scmp.ne.s32.totalorder %s1233_s4, %s1019_s16  ;;  %p1023_p0 = scmp.lt.u32.totalorder %s1019_s16, %s1233_s4 }
 0x349   :  { %p1025_p1 = pnand %p1023_p0, %p1020_p13 }
 0x34b   :  { %1028 = shalt.err (!%p1025_p1)
}
 0x34c   :  { %808 = dma.vmem_to_hbm [thread:$0]  %s806_s12, 32, %s1233_s4, [#allocation7]  }
 0x34d   :  { %1031 = dma.done.wait [#allocation7], 32  }
 0x34e   :  { %1032 = vsyncadd [#allocation7], 4294967264 }
 0x34f   :  { %812 = vsyncpa [#allocation6], 1 }
 0x350   :  { %813 = vsyncpa [#allocation7], 1 }

</bundles_post_ra>
